<compile_context>
chip_gen: v6e
topology: v6e:2x2x1
jax: 0.10.0
libtpu: 0.0.40
codegen_flags: <defaults>
</compile_context>

<pallas_src>
import functools

import jax
import jax.numpy as jnp
from jax import lax
from jax.experimental import pallas as pl
from jax.experimental.pallas import tpu as pltpu

_VMEM_LIMIT_BYTES = 32 * 1024 * 1024     # explicit scoped-VMEM limit (all gens)
_VMEM_TILE_BUDGET = 20 * 1024 * 1024     # per-tile activation budget (headroom)


def refinement_kernel(x_ref, w1s_ref, b1_ref, weo_ref, beo_ref, o_ref, *,
                      seg_len, use_roll, mxu_dtype):
    """One batch tile.
      x_ref   (c_in_p, n) f32        n = TB * seg_len, batches packed on lanes
      w1s_ref (c_conv_p, 5*c_in_p)   mxu_dtype, conv1 taps stacked along K
      b1_ref  (c_conv_p, 1) f32      conv1 bias
      weo_ref (n_out2p, 3*c_conv_p)  mxu_dtype, conv2(*)fc fused, even/odd in M
      beo_ref (n_out2p, 1) f32       fused conv2+fc bias
      o_ref   (n_out2p, n) f32       rows [0:n_out) even phase, [n_out:2n_out) odd
    """
    x = x_ref[...]
    n = x.shape[1]
    L = seg_len

    # Lane position inside its length-L batch segment.  Hoisted once and
    # reused by every shift mask (JAX does not CSE broadcast_in_dim).
    seg = lax.broadcasted_iota(jnp.int32, (1, n), 1) % L

    def shifted(v, shifts):
        """[y_s for s in shifts] with y_s[:, p] = v[:, p - s], zero-filled
        outside each length-L batch segment (batches packed along lanes)."""
        outs = []
        if not use_roll:
            # Fallback for lane widths that are not a multiple of 128.
            c = v.shape[0]
            pad_l = max(max(shifts), 0)
            pad_r = max(-min(shifts), 0)
            vp = jnp.concatenate(
                [jnp.zeros((c, pad_l), v.dtype), v,
                 jnp.zeros((c, pad_r), v.dtype)], axis=1)
        for s in shifts:
            if s == 0:
                outs.append(v)
                continue
            if use_roll:
                # XLU rotate (free slot); cross-segment wrap is masked below.
                y = pltpu.roll(v, shift=s % n, axis=1)
            else:
                y = vp[:, pad_l - s:pad_l - s + n]
            keep = jnp.logical_and(seg >= s, seg - s < L)
            outs.append(jnp.where(keep, y, 0.0).astype(v.dtype))
        return outs

    # conv1 (+bias, ReLU) as a single stacked bf16 matmul, f32 accumulation.
    xs = jnp.concatenate(shifted(x, [2, 1, 0, -1, -2]), axis=0)
    h1 = jnp.dot(w1s_ref[...], xs.astype(mxu_dtype),
                 preferred_element_type=jnp.float32)
    h1 = jnp.maximum(h1 + b1_ref[...], 0.0)

    # upsample(x2, nearest) -> conv2 -> fc fused into ONE polyphase matmul.
    hs = jnp.concatenate(shifted(h1, [1, 0, -1]), axis=0)
    out = jnp.dot(weo_ref[...], hs.astype(mxu_dtype),
                  preferred_element_type=jnp.float32)
    o_ref[...] = (out + beo_ref[...]).astype(o_ref.dtype)


def _round_up(v, m):
    return -(-v // m) * m


def pack_refinement_params(params, *, compute_dtype=jnp.bfloat16):
    """One-time weight prep (hoisted out of the per-call forward)."""
    w1, b1, w2, b2, wf, bf = params
    c_conv, c_in, k = w1.shape
    assert k == 5
    n_out = wf.shape[0]                       # = 2 * out_classes

    pad = 16 if compute_dtype == jnp.bfloat16 else 8
    c_in_p = _round_up(c_in, pad)
    c_conv_p = _round_up(c_conv, pad)
    n_out2p = _round_up(2 * n_out, pad)

    # conv1: stacked tap-major weight (c_conv_p, 5*c_in_p); bias separate.
    w1s = jnp.zeros((c_conv_p, 5 * c_in_p), jnp.float32)
    for t in range(5):
        w1s = w1s.at[:c_conv, t * c_in_p:t * c_in_p + c_in].set(w1[:, :, t])
    b1p = jnp.zeros((c_conv_p, 1), jnp.float32).at[:c_conv, 0].set(b1)

    # conv2 fused with fc; polyphase even/odd tap groups; bias separate.
    wf2 = jnp.einsum('mo,oit->mit', wf, w2)          # (n_out, c_conv, 5)
    bf_f = wf @ b2 + bf                              # (n_out,)
    blk_e = [wf2[..., 0] + wf2[..., 1], wf2[..., 2] + wf2[..., 3], wf2[..., 4]]
    blk_o = [wf2[..., 0], wf2[..., 1] + wf2[..., 2], wf2[..., 3] + wf2[..., 4]]
    w_eo = jnp.zeros((n_out2p, 3 * c_conv_p), jnp.float32)
    for j in range(3):
        w_eo = w_eo.at[:n_out, j * c_conv_p:j * c_conv_p + c_conv].set(blk_e[j])
        w_eo = w_eo.at[n_out:2 * n_out,
                       j * c_conv_p:j * c_conv_p + c_conv].set(blk_o[j])
    b_eo = jnp.zeros((n_out2p, 1), jnp.float32)
    b_eo = b_eo.at[:n_out, 0].set(bf_f).at[n_out:2 * n_out, 0].set(bf_f)

    arrays = (w1s.astype(compute_dtype), b1p, w_eo.astype(compute_dtype), b_eo)
    meta = dict(c_in=c_in, c_conv=c_conv, n_out=n_out, c_in_p=c_in_p,
                c_conv_p=c_conv_p, n_out2p=n_out2p, compute_dtype=compute_dtype)
    return arrays, meta


def _bytes_per_lane(c_in_p, c_conv_p, n_out2p, compute_bytes):
    """Rough per-lane-column VMEM footprint of one grid step: double-buffered
    in/out blocks plus the dominant in-kernel temporaries."""
    io = 2 * 4 * c_in_p + 2 * 4 * n_out2p
    tmp = (4 * 5 * c_in_p + compute_bytes * 5 * c_in_p        # shifted x + xs
           + 4 * 4 * c_conv_p + compute_bytes * 3 * c_conv_p  # h1 + shifts + hs
           + 4 * n_out2p)                                     # out pre-store
    return io + tmp


def _pick_batch_tile(B, L, bytes_per_lane):
    """Batch elements per grid step.  Tile lane width TB*L must be a multiple
    of 128 unless the tile covers the whole batch (full-array block).  Prefer
    1k-4k dense lanes, >= 2 grid steps (ideally even, so both v7x TensorCores
    get work), and keep the per-tile footprint under the VMEM budget."""
    cands = [tb for tb in range(1, B + 1)
             if B % tb == 0 and (tb * L) % 128 == 0]
    if not cands:
        cands = [B]                            # whole-batch fallback
    fits = [tb for tb in cands if tb * L * bytes_per_lane <= _VMEM_TILE_BUDGET]
    if not fits:
        fits = [min(cands)]

    def score(tb):
        lanes = tb * L
        n_blk = B // tb
        s = 0
        if lanes % 512 == 0:
            s += 1
        if 1024 <= lanes <= 4096:
            s += 4
        elif 512 <= lanes <= 8192:
            s += 2
        if n_blk >= 2:
            s += 2
            if n_blk % 2 == 0:
                s += 1
        return (s, lanes)

    return max(fits, key=score)


def refinement_forward(x, packed, *, meta):
    """x: (B, c_in, L) f32 -> (B, 2*out_classes, 2*L) f32."""
    w1s, b1p, w_eo, b_eo = packed
    B, c_in, L = x.shape
    assert c_in == meta['c_in']
    c_in_p = meta['c_in_p']
    c_conv_p = meta['c_conv_p']
    n_out = meta['n_out']
    n_out2p = meta['n_out2p']
    compute_dtype = meta['compute_dtype']
    compute_bytes = 2 if compute_dtype == jnp.bfloat16 else 4

    # ---- lane-dense, channel-padded activations: (c_in_p, B*L) ------------
    x_lane = jnp.zeros((c_in_p, B * L), jnp.float32)
    x_lane = x_lane.at[:c_in].set(
        jnp.transpose(x, (1, 0, 2)).reshape(c_in, B * L))

    TB = _pick_batch_tile(
        B, L, _bytes_per_lane(c_in_p, c_conv_p, n_out2p, compute_bytes))
    n_blk = B // TB
    use_roll = (TB * L) % 128 == 0

    kernel = functools.partial(refinement_kernel, seg_len=L,
                               use_roll=use_roll, mxu_dtype=compute_dtype)
    out_eo = pl.pallas_call(
        kernel,
        out_shape=jax.ShapeDtypeStruct((n_out2p, B * L), jnp.float32),
        grid_spec=pltpu.PrefetchScalarGridSpec(
            num_scalar_prefetch=0,
            grid=(n_blk,),
            in_specs=[
                pl.BlockSpec((c_in_p, TB * L), lambda i: (0, i)),
                pl.BlockSpec((c_conv_p, 5 * c_in_p), lambda i: (0, 0)),
                pl.BlockSpec((c_conv_p, 1), lambda i: (0, 0)),
                pl.BlockSpec((n_out2p, 3 * c_conv_p), lambda i: (0, 0)),
                pl.BlockSpec((n_out2p, 1), lambda i: (0, 0)),
            ],
            out_specs=pl.BlockSpec((n_out2p, TB * L), lambda i: (0, i)),
        ),
        compiler_params=pltpu.CompilerParams(
            dimension_semantics=("parallel",),
            vmem_limit_bytes=_VMEM_LIMIT_BYTES),
    )(x_lane, w1s, b1p, w_eo, b_eo)

    # ---- un-interleave even/odd phases -> (B, 2*out_classes, 2L) ----------
    ev = out_eo[:n_out].reshape(n_out, B, L)
    od = out_eo[n_out:2 * n_out].reshape(n_out, B, L)
    out = jnp.stack([ev, od], axis=-1).reshape(n_out, B, 2 * L)
    return jnp.transpose(out, (1, 0, 2))


def reference_forward(x, params):
    """Pure-JAX f32 reference matching the PyTorch forward (eval mode)."""
    w1, b1, w2, b2, wf, bf = params
    dn = ("NCH", "OIH", "NCH")
    h = lax.conv_general_dilated(x, w1, window_strides=(1,), padding="SAME",
                                 dimension_numbers=dn) + b1[None, :, None]
    h = jnp.maximum(h, 0.0)
    h = jnp.repeat(h, 2, axis=2)              # nearest-neighbor upsample x2
    h = lax.conv_general_dilated(h, w2, window_strides=(1,), padding="SAME",
                                 dimension_numbers=dn) + b2[None, :, None]
    h = jnp.transpose(h, (0, 2, 1))           # (B, 2L, c_conv)
    h = h @ wf.T + bf                         # (B, 2L, 2*out_classes)
    return jnp.transpose(h, (0, 2, 1))        # (B, 2*out_classes, 2L)


if __name__ == "__main__":
    B, c_in, L = 4, 6, 64
    c_conv, out_classes = 10, 3

    key = jax.random.PRNGKey(0)
    ks = jax.random.split(key, 7)
    x = jax.random.normal(ks[0], (B, c_in, L), dtype=jnp.float32)

    # deterministic parameter init (synthetic, not a checkpoint)
    w1 = 0.1 * jax.random.normal(ks[1], (c_conv, c_in, 5), dtype=jnp.float32)
    b1 = 0.1 * jax.random.normal(ks[2], (c_conv,), dtype=jnp.float32)
    w2 = 0.1 * jax.random.normal(ks[3], (c_conv, c_conv, 5), dtype=jnp.float32)
    b2 = 0.1 * jax.random.normal(ks[4], (c_conv,), dtype=jnp.float32)
    wf = 0.1 * jax.random.normal(ks[5], (2 * out_classes, c_conv),
                                 dtype=jnp.float32)
    bf = 0.1 * jax.random.normal(ks[6], (2 * out_classes,), dtype=jnp.float32)
    params = (w1, b1, w2, b2, wf, bf)

    # One-time weight packing (bf16 MXU operands, f32 accumulation in-kernel).
    packed, meta = pack_refinement_params(params, compute_dtype=jnp.bfloat16)
    fwd = jax.jit(functools.partial(refinement_forward, meta=meta))

    out = jax.block_until_ready(fwd(x, packed))
    ref = jax.block_until_ready(reference_forward(x, params))

    assert out.shape == (B, 2 * out_classes, 2 * L), out.shape
    err = float(jnp.max(jnp.abs(out - ref)))
    # bf16 MXU operands -> tolerance loosened vs the pure-f32 reference.
    assert err < 2e-2, err

    print("KERNEL_OK")
</pallas_src>

<mosaic_0001>
module attributes {stable_mosaic.version = 11 : i64} {
  func.func @refinement_kernel(%arg0: i32, %arg1: memref<16x128xf32, #tpu.memory_space<vmem>>, %arg2: memref<16x80xbf16, #tpu.memory_space<vmem>>, %arg3: memref<16x1xf32, #tpu.memory_space<vmem>>, %arg4: memref<16x48xbf16, #tpu.memory_space<vmem>>, %arg5: memref<16x1xf32, #tpu.memory_space<vmem>>, %arg6: memref<16x128xf32, #tpu.memory_space<vmem>>) attributes {dimension_semantics = [#tpu.dimension_semantics<parallel>], iteration_bounds = array<i64: 2>, scalar_prefetch = 0 : i64, scratch_operands = 0 : i64, tpu.core_type = #tpu.core_type<tc>, window_params = [{transform_indices = @transform_0, window_bounds = array<i64: 16, 128>}, {pipeline_mode = #tpu.pipeline_mode<synchronous>, transform_indices = @transform_1, window_bounds = array<i64: 16, 80>}, {pipeline_mode = #tpu.pipeline_mode<synchronous>, transform_indices = @transform_2, window_bounds = array<i64: 16, 1>}, {pipeline_mode = #tpu.pipeline_mode<synchronous>, transform_indices = @transform_3, window_bounds = array<i64: 16, 48>}, {pipeline_mode = #tpu.pipeline_mode<synchronous>, transform_indices = @transform_4, window_bounds = array<i64: 16, 1>}, {transform_indices = @transform_5, window_bounds = array<i64: 16, 128>}]} {
    %c0 = arith.constant 0 : index
    %c0_0 = arith.constant 0 : index
    %0 = vector.load %arg1[%c0, %c0_0] : memref<16x128xf32, #tpu.memory_space<vmem>>, vector<16x128xf32>
    %1 = tpu.iota {dimensions = array<i32: 1>} : vector<1x128xi32>
    %c64_i32 = arith.constant 64 : i32
    %c0_i32 = arith.constant 0 : i32
    %2 = arith.cmpi eq, %c64_i32, %c0_i32 : i32
    %c1_i32 = arith.constant 1 : i32
    %3 = arith.select %2, %c1_i32, %c64_i32 : i32
    %4 = vector.broadcast %3 : i32 to vector<1x128xi32>
    %5 = arith.remsi %1, %4 : vector<1x128xi32>
    %c0_i32_1 = arith.constant 0 : i32
    %6 = vector.broadcast %c0_i32_1 : i32 to vector<1x128xi32>
    %7 = arith.cmpi ne, %5, %6 : vector<1x128xi32>
    %c0_i32_2 = arith.constant 0 : i32
    %8 = vector.broadcast %c0_i32_2 : i32 to vector<1x128xi32>
    %9 = arith.cmpi slt, %5, %8 : vector<1x128xi32>
    %c0_i32_3 = arith.constant 0 : i32
    %10 = arith.cmpi slt, %3, %c0_i32_3 : i32
    %11 = vector.broadcast %10 : i1 to vector<1x128xi1>
    %12 = vector.broadcast %11 : vector<1x128xi1> to vector<1x128xi1>
    %13 = arith.xori %9, %12 : vector<1x128xi1>
    %14 = arith.andi %13, %7 : vector<1x128xi1>
    %15 = vector.broadcast %3 : i32 to vector<1x128xi32>
    %16 = arith.addi %5, %15 : vector<1x128xi32>
    %17 = arith.select %14, %16, %5 : vector<1x128xi1>, vector<1x128xi32>
    %c2_i32 = arith.constant 2 : i32
    %18 = tpu.dynamic_rotate %0 by %c2_i32 dim 1 : vector<16x128xf32>, i32 -> vector<16x128xf32>
    %c2_i32_4 = arith.constant 2 : i32
    %19 = vector.broadcast %c2_i32_4 : i32 to vector<1x128xi32>
    %20 = arith.cmpi sge, %17, %19 : vector<1x128xi32>
    %c2_i32_5 = arith.constant 2 : i32
    %21 = vector.broadcast %c2_i32_5 : i32 to vector<1x128xi32>
    %22 = arith.subi %17, %21 : vector<1x128xi32>
    %c64_i32_6 = arith.constant 64 : i32
    %23 = vector.broadcast %c64_i32_6 : i32 to vector<1x128xi32>
    %24 = arith.cmpi slt, %22, %23 : vector<1x128xi32>
    %25 = arith.andi %20, %24 : vector<1x128xi1>
    %cst = arith.constant 0.000000e+00 : f32
    %26 = vector.shape_cast %25 : vector<1x128xi1> to vector<1x128xi1>
    %27 = vector.broadcast %26 : vector<1x128xi1> to vector<16x128xi1>
    %28 = vector.broadcast %cst : f32 to vector<16x128xf32>
    %29 = arith.select %27, %18, %28 : vector<16x128xi1>, vector<16x128xf32>
    %c1_i32_7 = arith.constant 1 : i32
    %30 = tpu.dynamic_rotate %0 by %c1_i32_7 dim 1 : vector<16x128xf32>, i32 -> vector<16x128xf32>
    %c1_i32_8 = arith.constant 1 : i32
    %31 = vector.broadcast %c1_i32_8 : i32 to vector<1x128xi32>
    %32 = arith.cmpi sge, %17, %31 : vector<1x128xi32>
    %c1_i32_9 = arith.constant 1 : i32
    %33 = vector.broadcast %c1_i32_9 : i32 to vector<1x128xi32>
    %34 = arith.subi %17, %33 : vector<1x128xi32>
    %c64_i32_10 = arith.constant 64 : i32
    %35 = vector.broadcast %c64_i32_10 : i32 to vector<1x128xi32>
    %36 = arith.cmpi slt, %34, %35 : vector<1x128xi32>
    %37 = arith.andi %32, %36 : vector<1x128xi1>
    %cst_11 = arith.constant 0.000000e+00 : f32
    %38 = vector.shape_cast %37 : vector<1x128xi1> to vector<1x128xi1>
    %39 = vector.broadcast %38 : vector<1x128xi1> to vector<16x128xi1>
    %40 = vector.broadcast %cst_11 : f32 to vector<16x128xf32>
    %41 = arith.select %39, %30, %40 : vector<16x128xi1>, vector<16x128xf32>
    %c127_i32 = arith.constant 127 : i32
    %42 = tpu.dynamic_rotate %0 by %c127_i32 dim 1 : vector<16x128xf32>, i32 -> vector<16x128xf32>
    %c-1_i32 = arith.constant -1 : i32
    %43 = vector.broadcast %c-1_i32 : i32 to vector<1x128xi32>
    %44 = arith.cmpi sge, %17, %43 : vector<1x128xi32>
    %c-1_i32_12 = arith.constant -1 : i32
    %45 = vector.broadcast %c-1_i32_12 : i32 to vector<1x128xi32>
    %46 = arith.subi %17, %45 : vector<1x128xi32>
    %c64_i32_13 = arith.constant 64 : i32
    %47 = vector.broadcast %c64_i32_13 : i32 to vector<1x128xi32>
    %48 = arith.cmpi slt, %46, %47 : vector<1x128xi32>
    %49 = arith.andi %44, %48 : vector<1x128xi1>
    %cst_14 = arith.constant 0.000000e+00 : f32
    %50 = vector.shape_cast %49 : vector<1x128xi1> to vector<1x128xi1>
    %51 = vector.broadcast %50 : vector<1x128xi1> to vector<16x128xi1>
    %52 = vector.broadcast %cst_14 : f32 to vector<16x128xf32>
    %53 = arith.select %51, %42, %52 : vector<16x128xi1>, vector<16x128xf32>
    %c126_i32 = arith.constant 126 : i32
    %54 = tpu.dynamic_rotate %0 by %c126_i32 dim 1 : vector<16x128xf32>, i32 -> vector<16x128xf32>
    %c-2_i32 = arith.constant -2 : i32
    %55 = vector.broadcast %c-2_i32 : i32 to vector<1x128xi32>
    %56 = arith.cmpi sge, %17, %55 : vector<1x128xi32>
    %c-2_i32_15 = arith.constant -2 : i32
    %57 = vector.broadcast %c-2_i32_15 : i32 to vector<1x128xi32>
    %58 = arith.subi %17, %57 : vector<1x128xi32>
    %c64_i32_16 = arith.constant 64 : i32
    %59 = vector.broadcast %c64_i32_16 : i32 to vector<1x128xi32>
    %60 = arith.cmpi slt, %58, %59 : vector<1x128xi32>
    %61 = arith.andi %56, %60 : vector<1x128xi1>
    %cst_17 = arith.constant 0.000000e+00 : f32
    %62 = vector.shape_cast %61 : vector<1x128xi1> to vector<1x128xi1>
    %63 = vector.broadcast %62 : vector<1x128xi1> to vector<16x128xi1>
    %64 = vector.broadcast %cst_17 : f32 to vector<16x128xf32>
    %65 = arith.select %63, %54, %64 : vector<16x128xi1>, vector<16x128xf32>
    %66 = tpu.concatenate %29, %41, %0, %53, %65 in 0 : vector<16x128xf32>, vector<16x128xf32>, vector<16x128xf32>, vector<16x128xf32>, vector<16x128xf32> -> vector<80x128xf32>
    %c0_18 = arith.constant 0 : index
    %c0_19 = arith.constant 0 : index
    %67 = vector.load %arg2[%c0_18, %c0_19] : memref<16x80xbf16, #tpu.memory_space<vmem>>, vector<16x80xbf16>
    %68 = arith.truncf %66 : vector<80x128xf32> to vector<80x128xbf16>
    %cst_20 = arith.constant dense<0.000000e+00> : vector<16x128xf32>
    %69 = tpu.matmul %67, %68, %cst_20 {dimension_numbers = #tpu.dot_dimension_numbers<[1], [0], [0], [1], [0, 0, 1, 1], [], []>} : vector<16x80xbf16>, vector<80x128xbf16>, vector<16x128xf32> -> vector<16x128xf32>
    %c0_21 = arith.constant 0 : index
    %c0_22 = arith.constant 0 : index
    %70 = vector.load %arg3[%c0_21, %c0_22] : memref<16x1xf32, #tpu.memory_space<vmem>>, vector<16x1xf32>
    %71 = vector.broadcast %70 : vector<16x1xf32> to vector<16x128xf32>
    %72 = arith.addf %69, %71 : vector<16x128xf32>
    %cst_23 = arith.constant 0.000000e+00 : f32
    %73 = vector.broadcast %cst_23 : f32 to vector<16x128xf32>
    %74 = arith.maximumf %72, %73 : vector<16x128xf32>
    %c1_i32_24 = arith.constant 1 : i32
    %75 = tpu.dynamic_rotate %74 by %c1_i32_24 dim 1 : vector<16x128xf32>, i32 -> vector<16x128xf32>
    %c1_i32_25 = arith.constant 1 : i32
    %76 = vector.broadcast %c1_i32_25 : i32 to vector<1x128xi32>
    %77 = arith.cmpi sge, %17, %76 : vector<1x128xi32>
    %c1_i32_26 = arith.constant 1 : i32
    %78 = vector.broadcast %c1_i32_26 : i32 to vector<1x128xi32>
    %79 = arith.subi %17, %78 : vector<1x128xi32>
    %c64_i32_27 = arith.constant 64 : i32
    %80 = vector.broadcast %c64_i32_27 : i32 to vector<1x128xi32>
    %81 = arith.cmpi slt, %79, %80 : vector<1x128xi32>
    %82 = arith.andi %77, %81 : vector<1x128xi1>
    %cst_28 = arith.constant 0.000000e+00 : f32
    %83 = vector.shape_cast %82 : vector<1x128xi1> to vector<1x128xi1>
    %84 = vector.broadcast %83 : vector<1x128xi1> to vector<16x128xi1>
    %85 = vector.broadcast %cst_28 : f32 to vector<16x128xf32>
    %86 = arith.select %84, %75, %85 : vector<16x128xi1>, vector<16x128xf32>
    %c127_i32_29 = arith.constant 127 : i32
    %87 = tpu.dynamic_rotate %74 by %c127_i32_29 dim 1 : vector<16x128xf32>, i32 -> vector<16x128xf32>
    %c-1_i32_30 = arith.constant -1 : i32
    %88 = vector.broadcast %c-1_i32_30 : i32 to vector<1x128xi32>
    %89 = arith.cmpi sge, %17, %88 : vector<1x128xi32>
    %c-1_i32_31 = arith.constant -1 : i32
    %90 = vector.broadcast %c-1_i32_31 : i32 to vector<1x128xi32>
    %91 = arith.subi %17, %90 : vector<1x128xi32>
    %c64_i32_32 = arith.constant 64 : i32
    %92 = vector.broadcast %c64_i32_32 : i32 to vector<1x128xi32>
    %93 = arith.cmpi slt, %91, %92 : vector<1x128xi32>
    %94 = arith.andi %89, %93 : vector<1x128xi1>
    %cst_33 = arith.constant 0.000000e+00 : f32
    %95 = vector.shape_cast %94 : vector<1x128xi1> to vector<1x128xi1>
    %96 = vector.broadcast %95 : vector<1x128xi1> to vector<16x128xi1>
    %97 = vector.broadcast %cst_33 : f32 to vector<16x128xf32>
    %98 = arith.select %96, %87, %97 : vector<16x128xi1>, vector<16x128xf32>
    %99 = tpu.concatenate %86, %74, %98 in 0 : vector<16x128xf32>, vector<16x128xf32>, vector<16x128xf32> -> vector<48x128xf32>
    %c0_34 = arith.constant 0 : index
    %c0_35 = arith.constant 0 : index
    %100 = vector.load %arg4[%c0_34, %c0_35] : memref<16x48xbf16, #tpu.memory_space<vmem>>, vector<16x48xbf16>
    %101 = arith.truncf %99 : vector<48x128xf32> to vector<48x128xbf16>
    %cst_36 = arith.constant dense<0.000000e+00> : vector<16x128xf32>
    %102 = tpu.matmul %100, %101, %cst_36 {dimension_numbers = #tpu.dot_dimension_numbers<[1], [0], [0], [1], [0, 0, 1, 1], [], []>} : vector<16x48xbf16>, vector<48x128xbf16>, vector<16x128xf32> -> vector<16x128xf32>
    %c0_37 = arith.constant 0 : index
    %c0_38 = arith.constant 0 : index
    %103 = vector.load %arg5[%c0_37, %c0_38] : memref<16x1xf32, #tpu.memory_space<vmem>>, vector<16x1xf32>
    %104 = vector.broadcast %103 : vector<16x1xf32> to vector<16x128xf32>
    %105 = arith.addf %102, %104 : vector<16x128xf32>
    %c0_39 = arith.constant 0 : index
    %c0_40 = arith.constant 0 : index
    %106 = vector.load %arg6[%c0_39, %c0_40] : memref<16x128xf32, #tpu.memory_space<vmem>>, vector<16x128xf32>
    tpu.vector_store %arg6[%c0_39, %c0_40], %105 {strides = array<i32>} : memref<16x128xf32, #tpu.memory_space<vmem>>, vector<16x128xf32>,
    return
  }
  func.func @transform_0(%arg0: i32) -> (i32, i32) {
    %c0_i32 = arith.constant 0 : i32
    %c0_i32_0 = arith.constant 0 : i32
    return %c0_i32, %arg0 : i32, i32
  }
  func.func @transform_1(%arg0: i32) -> (i32, i32) {
    %c0_i32 = arith.constant 0 : i32
    %c0_i32_0 = arith.constant 0 : i32
    %c0_i32_1 = arith.constant 0 : i32
    return %c0_i32, %c0_i32_0 : i32, i32
  }
  func.func @transform_2(%arg0: i32) -> (i32, i32) {
    %c0_i32 = arith.constant 0 : i32
    %c0_i32_0 = arith.constant 0 : i32
    %c0_i32_1 = arith.constant 0 : i32
    return %c0_i32, %c0_i32_0 : i32, i32
  }
  func.func @transform_3(%arg0: i32) -> (i32, i32) {
    %c0_i32 = arith.constant 0 : i32
    %c0_i32_0 = arith.constant 0 : i32
    %c0_i32_1 = arith.constant 0 : i32
    return %c0_i32, %c0_i32_0 : i32, i32
  }
  func.func @transform_4(%arg0: i32) -> (i32, i32) {
    %c0_i32 = arith.constant 0 : i32
    %c0_i32_0 = arith.constant 0 : i32
    %c0_i32_1 = arith.constant 0 : i32
    return %c0_i32, %c0_i32_0 : i32, i32
  }
  func.func @transform_5(%arg0: i32) -> (i32, i32) {
    %c0_i32 = arith.constant 0 : i32
    %c0_i32_0 = arith.constant 0 : i32
    return %c0_i32, %arg0 : i32, i32
  }
}

</mosaic_0001>

<bundles_post_ra>
// kernel: refinement_forward.1
= control target key start
LH: loop header
LB: loop body
LE: loop exit
PB: predicated region body
PF: predicated region fallthrough
CT: control target
= control target key end

     0   :  { %s776_s18 = smov 0   ;;  %s778_s19 = smov 0   ;;  %s888_s0 = inlined_call_operand.vmem [shape: f32[16,256], index: 0, kind: input, shape index: {}]   ;;  %s889_s1 = inlined_call_operand.vmem [shape: bf16[16,80], index: 1, kind: input, shape index: {}]   ;;  %s890_s2 = inlined_call_operand.vmem [shape: f32[16,1], index: 2, kind: input, shape index: {}]   ;;  %s891_s3 = inlined_call_operand.vmem [shape: bf16[16,48], index: 3, kind: input, shape index: {}]   ;;  %s892_s4 = inlined_call_operand.vmem [shape: f32[16,1], index: 4, kind: input, shape index: {}]   ;;  %s893_s5 = inlined_call_operand.vmem [shape: f32[16,256], index: 5, kind: output, shape index: {}]  }
   0x1   :  { %s780_s20 = smov 0  }
   0x2 LB: > { %s577_s21 = sadd.s32 4294967295, %s737_s20   ;;  %s793_s22 = sadd.s32 1, %s737_s20   ;;  %s737_s20 = sphi %s780_s20, %s901_s20   ;;  %s733_s19 = sphi %s778_s19, %s900_s19   ;;  %s729_s18 = sphi %s776_s18, %s899_s18  }
   0x3   : > { %s19_s23 = ssub.s32 %s737_s20, %s793_s22  ;;  %s22_s24 = sadd.s32 1, %s733_s19 }
   0x4   : > { %p20_p0 = scmp.eq.s32.totalorder %s19_s23, 0  ;;  %p29_p1 = scmp.ne.s32.totalorder %s733_s19, %s729_s18 }
   0x5   : > { %p30_p2 = scmp.eq.s32.totalorder %s737_s20, 0  ;;  %p143_p3 = scmp.eq.s32.totalorder %s577_s21, 1 }
   0x6   : > { %s804_s25 = scalar_select %p20_p0, %s733_s19, %s22_s24  }
   0x7   : > { %p31_p4 = por %p30_p2, %p29_p1  ;;  %p806_p5 = por %p143_p3, %p29_p1 }
   0x8   : > { %p580_p6 = scmp.ge.s32.totalorder %s737_s20, 2 }
   0xa   : > { %177 = sbr.rel (%p580_p6) target bundleno = 20 (0x14), region = 32 }
   0xf   : > { %180 = sbr.rel (!%p31_p4) target bundleno = 20 (0x14), region = 36  ;;  %s182_s27 = sand.u32 (%p31_p4), 1, %s733_s19  }
  0x10   : > { %s582_s28 = sshll.u32 (%p31_p4), %s737_s20, 3  ;;  %s581_s29 = sshll.u32 (%p31_p4), %s182_s27, 4 }
  0x11   : > { %s186_s7 = scalar_lea.vmem (%p31_p4), %s888_s0, %s582_s28  ;;  %s184_s8 = scalar_lea.vmem (%p31_p4), [#allocation2], %s581_s29 }
  0x12   : > { %v217_v0 = vld [vmem:[%s186_s7] sm:$0xff] (%p31_p4)  ;;  %v219_v1 = vld [vmem:[%s186_s7 + $0x10] sm:$0xff] (%p31_p4) }
  0x13   : > { %218 = vst [vmem:[%s184_s8] sm:$0xff] (%p31_p4), %v217_v0  ;;  %220 = vst [vmem:[%s184_s8 + $0x8] sm:$0xff] (%p31_p4), %v219_v1 }
  0x14 PF: > { %p583_p7 = scmp.ge.s32.totalorder %s737_s20, 1  ;;  %p225_p8 = scmp.lt.s32.totalorder %s737_s20, 3 }
  0x16   : > { %p226_p9 = pnand %p583_p7, %p225_p8 }
  0x17   : > { %s232_s9 = sand.u32 (!%p226_p9), 1, %s729_s18   ;;  %s740_s12 = smov (!%p226_p9), 126  }
  0x18   : > { %229 = sbr.rel (%p226_p9) target bundleno = 711 (0x2c7), region = 74  ;;  %s819_s10 = sshll.u32 (!%p226_p9), %s232_s9, 4 }
  0x19   : > { %s234_s11 = scalar_lea.vmem (!%p226_p9), [#allocation2], %s819_s10  ;;  %s741_s13 = smov (!%p226_p9), 1  }
  0x1a   : > { %s742_s14 = smov (!%p226_p9), 127   ;;  %s743_s15 = smov (!%p226_p9), 2  }
  0x1b   : > { %s257_s9 = scalar_lea.vmem (!%p226_p9), [#allocation3], %s819_s10 }
  0x1d   : > { %v739_v2 = vmov 0.0   ;;  %v259_v3 = vld [vmem:[%s234_s11] sm:$0xff]  ;;  %v260_v4 = vld [vmem:[%s234_s11 + $0x8] sm:$0xff]  ;;  %vm744_vm0 = vmmov 0   ;;  %v745_v9 = vmov 0   ;;  %v261_v10 = vlaneseq  ;;  %s613_s11 = sshll.u32 (%p806_p5), %s577_s21, 3 }
  0x1e   : > { %626 = vmatprep.subr.bf16.mxu0 %v739_v2  ;;  %640 = vmatprep.subr.bf16.mxu1 %v739_v2  ;;  %v681_v5 = vpack.i.bf16 %v260_v4, %v259_v3  ;;  %v327_v6 = vpack.c.bf16 %v260_v4, %v259_v3  ;;  %v330_v7 = vld [vmem:[%s890_s2] sm:$0xff]  ;;  %v331_v8 = vld [vmem:[%s890_s2 + $0x8] sm:$0xff]  ;;  %vm347_vm9 = vcmask 654336   ;;  %vm428_vm10 = vcmask 392192  }
  0x1f   : > { %636 = vmatprep.mubr.msk.bf16.mxu0 %vm744_vm0, %v739_v2  ;;  %646 = vmatprep.mubr.msk.bf16.mxu1 %vm744_vm0, %v739_v2  ;;  %v262_v11 = vand.u32 127, %v261_v10  ;;  %v713_v33 = vld [vmem:[%s889_s1] sm:$0xff]   ;;  %v412_v46 = vld [vmem:[%s892_s4 + $0x8] sm:$0xff] }
  0x20   : > { %682 = vrot.lane.b32.xlu0 %v681_v5, %s740_s12  ;;  %692 = vrot.lane.b32.xlu1 %v681_v5, %s741_s13  ;;  %v411_v47 = vld [vmem:[%s892_s4] sm:$0xff] }
  0x21   : > { %701 = vset.pattern.permute.xlu0 %v745_v9  ;;  %702 = vset.pattern.permute.xlu1 %v745_v9  ;;  %v267_v12 = vand.u32 63, %v262_v11  ;;  %v714_v56 = vld [vmem:[%s891_s3] sm:$0xff]  }
  0x23   : > { %v589_v13 = vadd.s32 2, %v267_v12  ;;  %v588_v14 = vadd.s32 1, %v267_v12  ;;  %vm291_vm5 = vcmp.ge.s32.totalorder %v267_v12, 1  ;;  %vm279_vm7 = vcmp.ge.s32.totalorder %v267_v12, 2 }
  0x24   : > { %687 = vrot.lane.b32.xlu0 %v681_v5, %s742_s14  ;;  %697 = vrot.lane.b32.xlu1 %v681_v5, %s743_s15  ;;  %vm843_vm6 = vmpackc.low %vm291_vm5, %vm291_vm5 }
  0x25   : > { %vm317_vm1 = vcmp.lt.s32.totalorder %v589_v13, 64  ;;  %vm305_vm3 = vcmp.lt.s32.totalorder %v588_v14, 64  ;;  %vm600_vm8 = vmpackc.low %vm279_vm7, %vm279_vm7 }
  0x26   : > { %vm591_vm2 = vmpackc.low %vm317_vm1, %vm317_vm1 }
  0x27   : > { %vm835_vm4 = vmpackc.low %vm305_vm3, %vm305_vm3 }
  0x28   : > { %334 = vperm.xlu0 %701, %v330_v7   ;;  %339 = vperm.xlu1 %702, %v331_v8  }
  0x92   : > { %v683_v15 = vpop.permute.xlu0 %682  ;;  %v693_v20 = vpop.permute.xlu1 %692 }
  0x93   : > { %v685_v16 = vunpack.i.h.bf16 %v683_v15  ;;  %v684_v17 = vunpack.i.l.bf16 %v683_v15  ;;  %v695_v25 = vunpack.i.h.bf16 %v693_v20  ;;  %v694_v26 = vunpack.i.l.bf16 %v693_v20 }
  0x95   : > { %v592_v18 = vpack.c.bf16 %v685_v16, %v684_v17  ;;  %v598_v28 = vpack.c.bf16 %v695_v25, %v694_v26 }
  0x96   : > { %v688_v19 = vpop.permute.xlu0 %687  ;;  %v698_v27 = vpop.permute.xlu1 %697 }
  0x97   : > { %v690_v21 = vunpack.i.h.bf16 %v688_v19  ;;  %v689_v22 = vunpack.i.l.bf16 %v688_v19  ;;  %627 = vmatpush3.bf16.msk.msra.mxu0 %vm591_vm2, %v592_v18  ;;  %v700_v29 = vunpack.i.h.bf16 %v698_v27  ;;  %v699_v30 = vunpack.i.l.bf16 %v698_v27 }
  0x98   : > { %628 = vmatprep.subr.bf16.mxu0 %v739_v2 }
  0x99   : > { %v595_v24 = vpack.c.bf16 %v690_v21, %v689_v22  ;;  %v601_v32 = vpack.c.bf16 %v700_v29, %v699_v30 }
  0x9b   : > { %629 = vmatpush3.bf16.msk.msra.mxu0 %vm835_vm4, %v595_v24 }
  0x9c   : > { %630 = vmatprep.subr.bf16.mxu0 %v739_v2 }
  0x9f   : > { %631 = vmatpush3.bf16.msra.mxu0 %v327_v6 }
  0xa0   : > { %632 = vmatprep.subr.bf16.mxu0 %v739_v2 }
  0xa3   : > { %633 = vmatpush3.bf16.msk.msra.mxu0 %vm843_vm6, %v598_v28  ;;  %v335_v34 = vpop.permute.xlu0 %334  ;;  %v340_v37 = vpop.permute.xlu1 %339 }
  0xa4   : > { %634 = vmatprep.subr.bf16.mxu0 %v739_v2 }
  0xa7   : > { %635 = vmatpush3.bf16.msk.msra.mxu0 %vm600_vm8, %v601_v32 }
  0xaa   : > { %637 = vmatmul.mubr.msk.bf16.vlgmr.msra.gmra.mxu0 %vm347_vm9, %v713_v33 }
 0x16a   : > { %v385_v35 = vpop.f32.mrf.mxu0 }
 0x16b   : > { %v386_v38 = vadd.f32 %v385_v35, %v335_v34 }
 0x16c   : > { %v638_v36 = vpop.f32.mrf.mxu0 }
 0x16d   : > { %v392_v42 = vmax.f32 %v386_v38, 0.0 }
 0x16e   : > { %v388_v39 = vpop.f32.mrf.mxu0 }
 0x16f   : > { %v389_v40 = vadd.f32 %v388_v39, %v340_v37 }
 0x170   : > { %v639_v41 = vpop.f32.mrf.mxu0 }
 0x171   : > { %v393_v43 = vmax.f32 %v389_v40, 0.0 }
 0x173   : > { %v708_v44 = vpack.i.bf16 %v393_v43, %v392_v42  ;;  %v409_v45 = vpack.c.bf16 %v393_v43, %v392_v42 }
 0x175   : > { %709 = vrot.lane.b32.xlu0 %v708_v44, %s741_s13  ;;  %704 = vrot.lane.b32.xlu1 %v708_v44, %s742_s14  ;;  %s483_s14 = scalar_lea.vmem (%p806_p5), %s893_s5, %s613_s11 }
 0x179   : > { %420 = vperm.xlu0 %701, %v412_v46   ;;  %415 = vperm.xlu1 %702, %v411_v47  }
 0x1e7   : > { %v705_v48 = vpop.permute.xlu1 %704  ;;  %v710_v52 = vpop.permute.xlu0 %709 }
 0x1e8   : > { %v707_v49 = vunpack.i.h.bf16 %v705_v48  ;;  %v706_v50 = vunpack.i.l.bf16 %v705_v48  ;;  %v712_v53 = vunpack.i.h.bf16 %v710_v52  ;;  %v711_v54 = vunpack.i.l.bf16 %v710_v52 }
 0x1ea   : > { %v606_v51 = vpack.c.bf16 %v707_v49, %v706_v50  ;;  %v609_v55 = vpack.c.bf16 %v712_v53, %v711_v54 }
 0x1ec   : > { %641 = vmatpush3.bf16.msk.msra.mxu1 %vm835_vm4, %v606_v51 }
 0x1ed   : > { %642 = vmatprep.subr.bf16.mxu1 %v739_v2 }
 0x1f0   : > { %643 = vmatpush3.bf16.msra.mxu1 %v409_v45 }
 0x1f1   : > { %644 = vmatprep.subr.bf16.mxu1 %v739_v2 }
 0x1f4   : > { %645 = vmatpush3.bf16.msk.msra.mxu1 %vm843_vm6, %v609_v55  ;;  %v416_v57 = vpop.permute.xlu1 %415  ;;  %v421_v61 = vpop.permute.xlu0 %420 }
 0x1f7   : > { %647 = vmatmul.mubr.msk.bf16.vlgmr.msra.gmra.mxu1 %vm428_vm10, %v714_v56 }
 0x2b7   : > { %v466_v58 = vpop.f32.mrf.mxu1 }
 0x2b8   : > { %v467_v59 = vadd.f32 %v466_v58, %v416_v57 }
 0x2b9   : > { %v648_v60 = vpop.f32.mrf.mxu1 }
 0x2ba   : > { %473 = vst [vmem:[%s257_s9] sm:$0xff] %v467_v59  ;;  %481 = sbr.rel (!%p806_p5) target bundleno = 711 (0x2c7), region = 82 }
 0x2bb   : > { %v469_v62 = vpop.f32.mrf.mxu1 }
 0x2bc   : > { %v470_v63 = vadd.f32 %v469_v62, %v421_v61 }
 0x2bd   : > { %v649_v0 = vpop.f32.mrf.mxu1 }
 0x2be   : > { %474 = vst [vmem:[%s257_s9 + $0x8] sm:$0xff] %v470_v63 }
 0x2c1   : > { %v514_v1 = vld [vmem:[%s257_s9] sm:$0xff] }
 0x2c2   : > { %515 = vst [vmem:[%s483_s14] sm:$0xff] %v514_v1 }
 0x2c5   : > { %v516_v2 = vld [vmem:[%s257_s9 + $0x8] sm:$0xff] }
 0x2c6   : > { %517 = vst [vmem:[%s483_s14 + $0x10] sm:$0xff] %v516_v2 }
 0x2c7 PF: > { %p12_p10 = scmp.ge.s32.totalorder %s793_s22, 4   ;;  %s899_s18 = smov %s733_s19 }
 0x2c8   : > { %s900_s19 = smov %s804_s25  ;;  %s901_s20 = smov %s793_s22 }
 0x2c9   :  { %14 = sbr.rel (!%p12_p10) target bundleno = 2 (0x2), region = 151 }

</bundles_post_ra>
